<compile_context>
chip_gen: v7x
topology: tpu7x:2x2x1
jax: 0.10.0
libtpu: 0.0.40
codegen_flags: <defaults>
</compile_context>

<pallas_src>
import functools

import jax
import jax.numpy as jnp
from jax.experimental import pallas as pl
from jax.experimental.pallas import tpu as pltpu


# ----------------------------- fused kernel ----------------------------------


def _fused_mlp_kernel(x_ref, *refs, n_hidden, eps, slope):
    # refs layout: [w, b, gamma, beta] * n_hidden + [w_final, b_final] + [out]
    out_ref = refs[-1]
    prefs = refs[:-1]

    Bt, F, Din0 = x_ref.shape
    # Flatten (Bt, F) into MXU rows.  NOTE: keep F a multiple of 8 (or equal to
    # the full array dim, as here) so this reshape and the (Bt, F, Dout) view
    # around LayerNorm stay free (no VMEM relayout copy per layer).
    h = x_ref[...].reshape(Bt * F, Din0)

    idx = 0
    for _ in range(n_hidden):
        w = prefs[idx][...]          # (Din, Dout) bf16, pre-transposed
        b = prefs[idx + 1][...]      # (1, Dout)   f32
        g = prefs[idx + 2][...]      # (F, Dout)   f32
        beta = prefs[idx + 3][...]   # (F, Dout)   f32
        idx += 4
        Dout = w.shape[1]

        # Linear: bf16 MXU operands (weights already bf16), f32 accumulation.
        y = jnp.dot(h.astype(jnp.bfloat16), w,
                    preferred_element_type=jnp.float32) + b   # (Bt*F, Dout)
        y3 = y.reshape(Bt, F, Dout)

        # Per-sample LayerNorm over (F, Dout): two-pass mean/variance (matches
        # torch.nn.LayerNorm, biased var, eps=1e-5) to avoid E[x^2]-E[x]^2
        # cancellation.
        inv_n = 1.0 / float(F * Dout)
        mean = jnp.sum(jnp.sum(y3, axis=2, keepdims=True),
                       axis=1, keepdims=True) * inv_n
        d = y3 - mean
        var = jnp.sum(jnp.sum(d * d, axis=2, keepdims=True),
                      axis=1, keepdims=True) * inv_n
        y3 = d * jax.lax.rsqrt(var + eps) * g + beta

        # LeakyReLU (negative_slope = 0.01); Dropout(p=0) is the identity.
        y3 = jnp.maximum(y3, slope * y3)
        h = y3.reshape(Bt * F, Dout)

    # Final Linear (no norm / activation).
    wf = prefs[idx][...]        # (Din, out_num) bf16
    bf = prefs[idx + 1][...]    # (1, out_num)   f32
    yf = jnp.dot(h.astype(jnp.bfloat16), wf,
                 preferred_element_type=jnp.float32) + bf
    out_ref[...] = yf.reshape(Bt, F, wf.shape[1]).astype(out_ref.dtype)


# ----------------------------- wrapper ----------------------------------------


def _mxu_row_target():
    """Generation-aware MXU M-row target: 128 rows fill v5e's 128x128 MXUs,
    256 rows fill v6e/v7x's 256x256 MXUs."""
    try:
        kind = jax.devices()[0].device_kind.lower()
    except Exception:
        kind = ""
    if "v5" in kind or "v4" in kind or "v3" in kind:
        return 128
    return 256


def _pick_block_b(B, F, target_rows):
    """Samples per grid step.

    Small problems (B*F <= target_rows) run as ONE grid step on one
    TensorCore: splitting a tiny batch across v7x's two cores would duplicate
    the full weight DMA (the dominant traffic) for no MXU benefit.  Larger
    problems aim for Bt*F >= target_rows MXU rows, rounded so Bt*F is a
    multiple of 8 sublane rows."""
    total = B * F
    if total <= target_rows:
        return B
    bt = target_rows // max(F, 1)
    if bt * F < target_rows:
        bt += 1
    for extra in range(8):
        if ((bt + extra) * F) % 8 == 0:
            bt += extra
            break
    return max(1, min(bt, B))


def mlp_predicter_forward(params, x, *, eps=1e-5, slope=0.01):
    """params: output of init_mlp_params (weights pre-transposed, bf16).
    x: (B, feature_num, in_num) -> (B, out_num, feature_num)."""
    B, F, in_num = x.shape
    hidden = [p for p in params if p[0] == "hidden"]
    final = [p for p in params if p[0] == "final"][0]
    n_hidden = len(hidden)
    _, wf_t, bfin = final
    out_num = wf_t.shape[1]

    Bt = _pick_block_b(B, F, _mxu_row_target())
    n_steps = pl.cdiv(B, Bt)
    B_pad = n_steps * Bt
    if B_pad != B:
        # Pad the batch instead of shrinking Bt: keeps M large and the grid
        # short; padded rows are negligible extra FLOPs and are sliced off.
        x = jnp.pad(x, ((0, B_pad - B), (0, 0), (0, 0)))

    in_specs = [pl.BlockSpec((Bt, F, in_num), lambda i: (i, 0, 0))]
    args = [x]
    flops = 0
    param_bytes = 0
    for (_, w_t, b, gamma, beta) in hidden:
        Din, Dout = w_t.shape
        # Constant index_map -> the pipeline never re-fetches these blocks
        # across grid steps.  (pipeline_mode=pl.Buffered(1) would additionally
        # halve their VMEM residency; default buffering kept for portability.)
        in_specs += [
            pl.BlockSpec((Din, Dout), lambda i: (0, 0)),
            pl.BlockSpec((1, Dout), lambda i: (0, 0)),
            pl.BlockSpec((F, Dout), lambda i: (0, 0)),
            pl.BlockSpec((F, Dout), lambda i: (0, 0)),
        ]
        args += [w_t, b, gamma, beta]
        flops += 2 * B_pad * F * Din * Dout
        param_bytes += (Din * Dout * w_t.dtype.itemsize
                        + (Dout + 2 * F * Dout) * 4)
    Dinf = wf_t.shape[0]
    in_specs += [
        pl.BlockSpec((Dinf, out_num), lambda i: (0, 0)),
        pl.BlockSpec((1, out_num), lambda i: (0, 0)),
    ]
    args += [wf_t, bfin]
    flops += 2 * B_pad * F * Dinf * out_num
    param_bytes += Dinf * out_num * wf_t.dtype.itemsize + out_num * 4

    bytes_accessed = (param_bytes
                      + B_pad * F * in_num * 4      # input
                      + B_pad * F * out_num * 4)    # output

    kernel = functools.partial(_fused_mlp_kernel, n_hidden=n_hidden,
                               eps=eps, slope=slope)
    out = pl.pallas_call(
        kernel,
        out_shape=jax.ShapeDtypeStruct((B_pad, F, out_num), jnp.float32),
        grid_spec=pltpu.PrefetchScalarGridSpec(
            num_scalar_prefetch=0,
            grid=(n_steps,),
            in_specs=in_specs,
            # out_num < 128 lanes -> masked stores, negligible at ~KiB output.
            # Present a lane-dense 2-D (Bt*F, out_num) slab if out_num grows.
            out_specs=pl.BlockSpec((Bt, F, out_num), lambda i: (i, 0, 0)),
        ),
        compiler_params=pltpu.CompilerParams(
            dimension_semantics=("parallel",)),
        cost_estimate=pl.CostEstimate(
            flops=int(flops),
            transcendentals=int(n_hidden * B_pad),
            bytes_accessed=int(bytes_accessed)),
    )(*args)

    out = out[:B]
    # matches `out.permute(0, 2, 1)` in the PyTorch forward (tiny glue op).
    return jnp.transpose(out, (0, 2, 1))


# ----------------------- parameter init & reference --------------------------


def init_mlp_params(key, in_num, out_num, layer_num, feature_num, inter_num=512):
    """PyTorch-style init (uniform +-1/sqrt(fan_in); LN gamma=1, beta=0).
    Weights are stored PRE-TRANSPOSED as (Din, Dout) and PRE-CAST to bf16 so
    the kernel does no per-call transposes or operand casts; biases and LN
    affine params stay f32."""
    params = []
    for i in range(layer_num):
        if i == layer_num - 1:
            fan_in = in_num if layer_num == 1 else inter_num
            key, k1, k2 = jax.random.split(key, 3)
            bound = 1.0 / float(fan_in) ** 0.5
            w = jax.random.uniform(k1, (out_num, fan_in), jnp.float32, -bound, bound)
            b = jax.random.uniform(k2, (out_num,), jnp.float32, -bound, bound)
            params.append(("final", jnp.asarray(w.T).astype(jnp.bfloat16),
                           b.reshape(1, out_num)))
        else:
            fan_in = in_num if i == 0 else inter_num
            key, k1, k2 = jax.random.split(key, 3)
            bound = 1.0 / float(fan_in) ** 0.5
            w = jax.random.uniform(k1, (inter_num, fan_in), jnp.float32, -bound, bound)
            b = jax.random.uniform(k2, (inter_num,), jnp.float32, -bound, bound)
            gamma = jnp.ones((feature_num, inter_num), jnp.float32)
            beta = jnp.zeros((feature_num, inter_num), jnp.float32)
            params.append(("hidden", jnp.asarray(w.T).astype(jnp.bfloat16),
                           b.reshape(1, inter_num), gamma, beta))
    return params


def mlp_predicter_reference(params, x):
    """Pure-JAX reference with the same numerics contract as the kernel
    (bf16 weights + bf16 activations into the dot, f32 accumulation, f32
    LayerNorm) so the comparison tolerance can be ~1e-3."""
    out = x
    for p in params:
        if p[0] == "hidden":
            _, w_t, b, gamma, beta = p
            out = jnp.dot(out.astype(jnp.bfloat16), w_t,
                          preferred_element_type=jnp.float32) + b.reshape(-1)
            mean = jnp.mean(out, axis=(1, 2), keepdims=True)
            var = jnp.mean((out - mean) ** 2, axis=(1, 2), keepdims=True)
            out = (out - mean) * jax.lax.rsqrt(var + 1e-5)
            out = out * gamma + beta
            out = jnp.where(out >= 0, out, 0.01 * out)
        else:
            _, w_t, b = p
            out = jnp.dot(out.astype(jnp.bfloat16), w_t,
                          preferred_element_type=jnp.float32) + b.reshape(-1)
    return jnp.transpose(out, (0, 2, 1))


# --------------------------------- main ---------------------------------------

if __name__ == "__main__":
    B = 2            # batch
    feature_num = 8  # second ("feature") axis
    in_num = 32      # input channel size
    inter_num = 128  # hidden width
    out_num = 16     # output channel size
    layer_num = 3    # 2 hidden (Linear+LN+LeakyReLU) layers + final Linear

    key = jax.random.PRNGKey(0)
    key_x, key_p, key_x2 = jax.random.split(key, 3)
    x = jax.random.normal(key_x, (B, feature_num, in_num), dtype=jnp.float32)

    params = init_mlp_params(key_p, in_num, out_num, layer_num, feature_num,
                             inter_num)

    fwd = jax.jit(lambda xx: mlp_predicter_forward(params, xx))
    out = jax.block_until_ready(fwd(x))
    assert out.shape == (B, out_num, feature_num), out.shape

    ref = mlp_predicter_reference(params, x)
    assert jnp.allclose(out, ref, atol=1e-3, rtol=1e-3), \
        float(jnp.max(jnp.abs(out - ref)))

    # Also exercise the padded-batch path (B*F > row target, B % Bt != 0).
    B2 = 33
    x2 = jax.random.normal(key_x2, (B2, feature_num, in_num), dtype=jnp.float32)
    out2 = jax.block_until_ready(
        jax.jit(lambda xx: mlp_predicter_forward(params, xx))(x2))
    ref2 = mlp_predicter_reference(params, x2)
    assert out2.shape == (B2, out_num, feature_num), out2.shape
    assert jnp.allclose(out2, ref2, atol=1e-3, rtol=1e-3), \
        float(jnp.max(jnp.abs(out2 - ref2)))

    print("KERNEL_OK")
</pallas_src>

<mosaic_0001>
module attributes {stable_mosaic.version = 11 : i64} {
  func.func @_fused_mlp_kernel(%arg0: i32, %arg1: memref<2x8x32xf32, #tpu.memory_space<vmem>>, %arg2: memref<32x128xbf16, #tpu.memory_space<vmem>>, %arg3: memref<1x128xf32, #tpu.memory_space<vmem>>, %arg4: memref<8x128xf32, #tpu.memory_space<vmem>>, %arg5: memref<8x128xf32, #tpu.memory_space<vmem>>, %arg6: memref<128x128xbf16, #tpu.memory_space<vmem>>, %arg7: memref<1x128xf32, #tpu.memory_space<vmem>>, %arg8: memref<8x128xf32, #tpu.memory_space<vmem>>, %arg9: memref<8x128xf32, #tpu.memory_space<vmem>>, %arg10: memref<128x16xbf16, #tpu.memory_space<vmem>>, %arg11: memref<1x16xf32, #tpu.memory_space<vmem>>, %arg12: memref<2x8x16xf32, #tpu.memory_space<vmem>>) attributes {dimension_semantics = [#tpu.dimension_semantics<parallel>], iteration_bounds = array<i64: 1>, scalar_prefetch = 0 : i64, scratch_operands = 0 : i64, tpu.core_type = #tpu.core_type<tc>, window_params = [{transform_indices = @transform_0, window_bounds = array<i64: 2, 8, 32>}, {pipeline_mode = #tpu.pipeline_mode<synchronous>, transform_indices = @transform_1, window_bounds = array<i64: 32, 128>}, {pipeline_mode = #tpu.pipeline_mode<synchronous>, transform_indices = @transform_2, window_bounds = array<i64: 1, 128>}, {pipeline_mode = #tpu.pipeline_mode<synchronous>, transform_indices = @transform_3, window_bounds = array<i64: 8, 128>}, {pipeline_mode = #tpu.pipeline_mode<synchronous>, transform_indices = @transform_4, window_bounds = array<i64: 8, 128>}, {pipeline_mode = #tpu.pipeline_mode<synchronous>, transform_indices = @transform_5, window_bounds = array<i64: 128, 128>}, {pipeline_mode = #tpu.pipeline_mode<synchronous>, transform_indices = @transform_6, window_bounds = array<i64: 1, 128>}, {pipeline_mode = #tpu.pipeline_mode<synchronous>, transform_indices = @transform_7, window_bounds = array<i64: 8, 128>}, {pipeline_mode = #tpu.pipeline_mode<synchronous>, transform_indices = @transform_8, window_bounds = array<i64: 8, 128>}, {pipeline_mode = #tpu.pipeline_mode<synchronous>, transform_indices = @transform_9, window_bounds = array<i64: 128, 16>}, {pipeline_mode = #tpu.pipeline_mode<synchronous>, transform_indices = @transform_10, window_bounds = array<i64: 1, 16>}, {transform_indices = @transform_11, window_bounds = array<i64: 2, 8, 16>}]} {
    %c0 = arith.constant 0 : index
    %c0_0 = arith.constant 0 : index
    %c0_1 = arith.constant 0 : index
    %0 = vector.load %arg1[%c0, %c0_0, %c0_1] : memref<2x8x32xf32, #tpu.memory_space<vmem>>, vector<2x8x32xf32>
    %1 = vector.shape_cast %0 : vector<2x8x32xf32> to vector<16x32xf32>
    %c0_2 = arith.constant 0 : index
    %c0_3 = arith.constant 0 : index
    %2 = vector.load %arg2[%c0_2, %c0_3] : memref<32x128xbf16, #tpu.memory_space<vmem>>, vector<32x128xbf16>
    %c0_4 = arith.constant 0 : index
    %c0_5 = arith.constant 0 : index
    %3 = vector.load %arg3[%c0_4, %c0_5] : memref<1x128xf32, #tpu.memory_space<vmem>>, vector<1x128xf32>
    %c0_6 = arith.constant 0 : index
    %c0_7 = arith.constant 0 : index
    %4 = vector.load %arg4[%c0_6, %c0_7] : memref<8x128xf32, #tpu.memory_space<vmem>>, vector<8x128xf32>
    %c0_8 = arith.constant 0 : index
    %c0_9 = arith.constant 0 : index
    %5 = vector.load %arg5[%c0_8, %c0_9] : memref<8x128xf32, #tpu.memory_space<vmem>>, vector<8x128xf32>
    %6 = arith.truncf %1 : vector<16x32xf32> to vector<16x32xbf16>
    %cst = arith.constant dense<0.000000e+00> : vector<16x128xf32>
    %7 = tpu.matmul %6, %2, %cst {dimension_numbers = #tpu.dot_dimension_numbers<[1], [0], [0], [1], [0, 0, 1, 1], [], []>} : vector<16x32xbf16>, vector<32x128xbf16>, vector<16x128xf32> -> vector<16x128xf32>
    %8 = vector.broadcast %3 : vector<1x128xf32> to vector<16x128xf32>
    %9 = arith.addf %7, %8 : vector<16x128xf32>
    %10 = vector.shape_cast %9 : vector<16x128xf32> to vector<2x8x128xf32>
    %cst_10 = arith.constant dense<0.000000e+00> : vector<2x8xf32>
    %11 = vector.multi_reduction <add>, %10, %cst_10 [2] : vector<2x8x128xf32> to vector<2x8xf32>
    %12 = vector.shape_cast %11 : vector<2x8xf32> to vector<2x8x1xf32>
    %cst_11 = arith.constant dense<0.000000e+00> : vector<2x1xf32>
    %13 = vector.multi_reduction <add>, %12, %cst_11 [1] : vector<2x8x1xf32> to vector<2x1xf32>
    %14 = vector.shape_cast %13 : vector<2x1xf32> to vector<2x1x1xf32>
    %cst_12 = arith.constant 9.765625E-4 : f32
    %15 = vector.broadcast %cst_12 : f32 to vector<2x1x1xf32>
    %16 = arith.mulf %14, %15 : vector<2x1x1xf32>
    %17 = vector.broadcast %16 : vector<2x1x1xf32> to vector<2x8x128xf32>
    %18 = arith.subf %10, %17 : vector<2x8x128xf32>
    %19 = arith.mulf %18, %18 : vector<2x8x128xf32>
    %cst_13 = arith.constant dense<0.000000e+00> : vector<2x8xf32>
    %20 = vector.multi_reduction <add>, %19, %cst_13 [2] : vector<2x8x128xf32> to vector<2x8xf32>
    %21 = vector.shape_cast %20 : vector<2x8xf32> to vector<2x8x1xf32>
    %cst_14 = arith.constant dense<0.000000e+00> : vector<2x1xf32>
    %22 = vector.multi_reduction <add>, %21, %cst_14 [1] : vector<2x8x1xf32> to vector<2x1xf32>
    %23 = vector.shape_cast %22 : vector<2x1xf32> to vector<2x1x1xf32>
    %cst_15 = arith.constant 9.765625E-4 : f32
    %24 = vector.broadcast %cst_15 : f32 to vector<2x1x1xf32>
    %25 = arith.mulf %23, %24 : vector<2x1x1xf32>
    %cst_16 = arith.constant 9.99999974E-6 : f32
    %26 = vector.broadcast %cst_16 : f32 to vector<2x1x1xf32>
    %27 = arith.addf %25, %26 : vector<2x1x1xf32>
    %28 = math.rsqrt %27 : vector<2x1x1xf32>
    %29 = vector.broadcast %28 : vector<2x1x1xf32> to vector<2x8x128xf32>
    %30 = arith.mulf %18, %29 : vector<2x8x128xf32>
    %31 = vector.shape_cast %4 : vector<8x128xf32> to vector<1x8x128xf32>
    %32 = vector.broadcast %31 : vector<1x8x128xf32> to vector<2x8x128xf32>
    %33 = arith.mulf %30, %32 : vector<2x8x128xf32>
    %34 = vector.shape_cast %5 : vector<8x128xf32> to vector<1x8x128xf32>
    %35 = vector.broadcast %34 : vector<1x8x128xf32> to vector<2x8x128xf32>
    %36 = arith.addf %33, %35 : vector<2x8x128xf32>
    %cst_17 = arith.constant 0.00999999977 : f32
    %37 = vector.broadcast %cst_17 : f32 to vector<2x8x128xf32>
    %38 = arith.mulf %37, %36 : vector<2x8x128xf32>
    %39 = arith.maximumf %36, %38 : vector<2x8x128xf32>
    %40 = vector.shape_cast %39 : vector<2x8x128xf32> to vector<16x128xf32>
    %c0_18 = arith.constant 0 : index
    %c0_19 = arith.constant 0 : index
    %41 = vector.load %arg6[%c0_18, %c0_19] : memref<128x128xbf16, #tpu.memory_space<vmem>>, vector<128x128xbf16>
    %c0_20 = arith.constant 0 : index
    %c0_21 = arith.constant 0 : index
    %42 = vector.load %arg7[%c0_20, %c0_21] : memref<1x128xf32, #tpu.memory_space<vmem>>, vector<1x128xf32>
    %c0_22 = arith.constant 0 : index
    %c0_23 = arith.constant 0 : index
    %43 = vector.load %arg8[%c0_22, %c0_23] : memref<8x128xf32, #tpu.memory_space<vmem>>, vector<8x128xf32>
    %c0_24 = arith.constant 0 : index
    %c0_25 = arith.constant 0 : index
    %44 = vector.load %arg9[%c0_24, %c0_25] : memref<8x128xf32, #tpu.memory_space<vmem>>, vector<8x128xf32>
    %45 = arith.truncf %40 : vector<16x128xf32> to vector<16x128xbf16>
    %cst_26 = arith.constant dense<0.000000e+00> : vector<16x128xf32>
    %46 = tpu.matmul %45, %41, %cst_26 {dimension_numbers = #tpu.dot_dimension_numbers<[1], [0], [0], [1], [0, 0, 1, 1], [], []>} : vector<16x128xbf16>, vector<128x128xbf16>, vector<16x128xf32> -> vector<16x128xf32>
    %47 = vector.broadcast %42 : vector<1x128xf32> to vector<16x128xf32>
    %48 = arith.addf %46, %47 : vector<16x128xf32>
    %49 = vector.shape_cast %48 : vector<16x128xf32> to vector<2x8x128xf32>
    %cst_27 = arith.constant dense<0.000000e+00> : vector<2x8xf32>
    %50 = vector.multi_reduction <add>, %49, %cst_27 [2] : vector<2x8x128xf32> to vector<2x8xf32>
    %51 = vector.shape_cast %50 : vector<2x8xf32> to vector<2x8x1xf32>
    %cst_28 = arith.constant dense<0.000000e+00> : vector<2x1xf32>
    %52 = vector.multi_reduction <add>, %51, %cst_28 [1] : vector<2x8x1xf32> to vector<2x1xf32>
    %53 = vector.shape_cast %52 : vector<2x1xf32> to vector<2x1x1xf32>
    %cst_29 = arith.constant 9.765625E-4 : f32
    %54 = vector.broadcast %cst_29 : f32 to vector<2x1x1xf32>
    %55 = arith.mulf %53, %54 : vector<2x1x1xf32>
    %56 = vector.broadcast %55 : vector<2x1x1xf32> to vector<2x8x128xf32>
    %57 = arith.subf %49, %56 : vector<2x8x128xf32>
    %58 = arith.mulf %57, %57 : vector<2x8x128xf32>
    %cst_30 = arith.constant dense<0.000000e+00> : vector<2x8xf32>
    %59 = vector.multi_reduction <add>, %58, %cst_30 [2] : vector<2x8x128xf32> to vector<2x8xf32>
    %60 = vector.shape_cast %59 : vector<2x8xf32> to vector<2x8x1xf32>
    %cst_31 = arith.constant dense<0.000000e+00> : vector<2x1xf32>
    %61 = vector.multi_reduction <add>, %60, %cst_31 [1] : vector<2x8x1xf32> to vector<2x1xf32>
    %62 = vector.shape_cast %61 : vector<2x1xf32> to vector<2x1x1xf32>
    %cst_32 = arith.constant 9.765625E-4 : f32
    %63 = vector.broadcast %cst_32 : f32 to vector<2x1x1xf32>
    %64 = arith.mulf %62, %63 : vector<2x1x1xf32>
    %cst_33 = arith.constant 9.99999974E-6 : f32
    %65 = vector.broadcast %cst_33 : f32 to vector<2x1x1xf32>
    %66 = arith.addf %64, %65 : vector<2x1x1xf32>
    %67 = math.rsqrt %66 : vector<2x1x1xf32>
    %68 = vector.broadcast %67 : vector<2x1x1xf32> to vector<2x8x128xf32>
    %69 = arith.mulf %57, %68 : vector<2x8x128xf32>
    %70 = vector.shape_cast %43 : vector<8x128xf32> to vector<1x8x128xf32>
    %71 = vector.broadcast %70 : vector<1x8x128xf32> to vector<2x8x128xf32>
    %72 = arith.mulf %69, %71 : vector<2x8x128xf32>
    %73 = vector.shape_cast %44 : vector<8x128xf32> to vector<1x8x128xf32>
    %74 = vector.broadcast %73 : vector<1x8x128xf32> to vector<2x8x128xf32>
    %75 = arith.addf %72, %74 : vector<2x8x128xf32>
    %cst_34 = arith.constant 0.00999999977 : f32
    %76 = vector.broadcast %cst_34 : f32 to vector<2x8x128xf32>
    %77 = arith.mulf %76, %75 : vector<2x8x128xf32>
    %78 = arith.maximumf %75, %77 : vector<2x8x128xf32>
    %79 = vector.shape_cast %78 : vector<2x8x128xf32> to vector<16x128xf32>
    %c0_35 = arith.constant 0 : index
    %c0_36 = arith.constant 0 : index
    %80 = vector.load %arg10[%c0_35, %c0_36] : memref<128x16xbf16, #tpu.memory_space<vmem>>, vector<128x16xbf16>
    %c0_37 = arith.constant 0 : index
    %c0_38 = arith.constant 0 : index
    %81 = vector.load %arg11[%c0_37, %c0_38] : memref<1x16xf32, #tpu.memory_space<vmem>>, vector<1x16xf32>
    %82 = arith.truncf %79 : vector<16x128xf32> to vector<16x128xbf16>
    %cst_39 = arith.constant dense<0.000000e+00> : vector<16x16xf32>
    %83 = tpu.matmul %82, %80, %cst_39 {dimension_numbers = #tpu.dot_dimension_numbers<[1], [0], [0], [1], [0, 0, 1, 1], [], []>} : vector<16x128xbf16>, vector<128x16xbf16>, vector<16x16xf32> -> vector<16x16xf32>
    %84 = vector.broadcast %81 : vector<1x16xf32> to vector<16x16xf32>
    %85 = arith.addf %83, %84 : vector<16x16xf32>
    %86 = vector.shape_cast %85 : vector<16x16xf32> to vector<2x8x16xf32>
    %c0_40 = arith.constant 0 : index
    %c0_41 = arith.constant 0 : index
    %c0_42 = arith.constant 0 : index
    %87 = vector.load %arg12[%c0_40, %c0_41, %c0_42] : memref<2x8x16xf32, #tpu.memory_space<vmem>>, vector<2x8x16xf32>
    tpu.vector_store %arg12[%c0_40, %c0_41, %c0_42], %86 {strides = array<i32>} : memref<2x8x16xf32, #tpu.memory_space<vmem>>, vector<2x8x16xf32>,
    return
  }
  func.func @transform_0(%arg0: i32) -> (i32, i32, i32) {
    %c0_i32 = arith.constant 0 : i32
    %c0_i32_0 = arith.constant 0 : i32
    %c0_i32_1 = arith.constant 0 : i32
    return %arg0, %c0_i32, %c0_i32_0 : i32, i32, i32
  }
  func.func @transform_1(%arg0: i32) -> (i32, i32) {
    %c0_i32 = arith.constant 0 : i32
    %c0_i32_0 = arith.constant 0 : i32
    %c0_i32_1 = arith.constant 0 : i32
    return %c0_i32, %c0_i32_0 : i32, i32
  }
  func.func @transform_2(%arg0: i32) -> (i32, i32) {
    %c0_i32 = arith.constant 0 : i32
    %c0_i32_0 = arith.constant 0 : i32
    %c0_i32_1 = arith.constant 0 : i32
    return %c0_i32, %c0_i32_0 : i32, i32
  }
  func.func @transform_3(%arg0: i32) -> (i32, i32) {
    %c0_i32 = arith.constant 0 : i32
    %c0_i32_0 = arith.constant 0 : i32
    %c0_i32_1 = arith.constant 0 : i32
    return %c0_i32, %c0_i32_0 : i32, i32
  }
  func.func @transform_4(%arg0: i32) -> (i32, i32) {
    %c0_i32 = arith.constant 0 : i32
    %c0_i32_0 = arith.constant 0 : i32
    %c0_i32_1 = arith.constant 0 : i32
    return %c0_i32, %c0_i32_0 : i32, i32
  }
  func.func @transform_5(%arg0: i32) -> (i32, i32) {
    %c0_i32 = arith.constant 0 : i32
    %c0_i32_0 = arith.constant 0 : i32
    %c0_i32_1 = arith.constant 0 : i32
    return %c0_i32, %c0_i32_0 : i32, i32
  }
  func.func @transform_6(%arg0: i32) -> (i32, i32) {
    %c0_i32 = arith.constant 0 : i32
    %c0_i32_0 = arith.constant 0 : i32
    %c0_i32_1 = arith.constant 0 : i32
    return %c0_i32, %c0_i32_0 : i32, i32
  }
  func.func @transform_7(%arg0: i32) -> (i32, i32) {
    %c0_i32 = arith.constant 0 : i32
    %c0_i32_0 = arith.constant 0 : i32
    %c0_i32_1 = arith.constant 0 : i32
    return %c0_i32, %c0_i32_0 : i32, i32
  }
  func.func @transform_8(%arg0: i32) -> (i32, i32) {
    %c0_i32 = arith.constant 0 : i32
    %c0_i32_0 = arith.constant 0 : i32
    %c0_i32_1 = arith.constant 0 : i32
    return %c0_i32, %c0_i32_0 : i32, i32
  }
  func.func @transform_9(%arg0: i32) -> (i32, i32) {
    %c0_i32 = arith.constant 0 : i32
    %c0_i32_0 = arith.constant 0 : i32
    %c0_i32_1 = arith.constant 0 : i32
    return %c0_i32, %c0_i32_0 : i32, i32
  }
  func.func @transform_10(%arg0: i32) -> (i32, i32) {
    %c0_i32 = arith.constant 0 : i32
    %c0_i32_0 = arith.constant 0 : i32
    %c0_i32_1 = arith.constant 0 : i32
    return %c0_i32, %c0_i32_0 : i32, i32
  }
  func.func @transform_11(%arg0: i32) -> (i32, i32, i32) {
    %c0_i32 = arith.constant 0 : i32
    %c0_i32_0 = arith.constant 0 : i32
    %c0_i32_1 = arith.constant 0 : i32
    return %arg0, %c0_i32, %c0_i32_0 : i32, i32, i32
  }
}

</mosaic_0001>

<bundles_post_ra>
// kernel: _lambda_.1
= control target key start
LH: loop header
LB: loop body
LE: loop exit
PB: predicated region body
PF: predicated region fallthrough
CT: control target
= control target key end

     0   :  { %16 = vsyncpa [#allocation3], 0  ;;  %s855_s0 = inlined_call_operand.vmem [shape: f32[2,8,32], index: 0, kind: input, shape index: {}]   ;;  %s856_s1 = inlined_call_operand.vmem [shape: bf16[32,128], index: 1, kind: input, shape index: {}]   ;;  %s857_s2 = inlined_call_operand.vmem [shape: f32[1,128], index: 2, kind: input, shape index: {}]   ;;  %s858_s3 = inlined_call_operand.vmem [shape: f32[8,128], index: 3, kind: input, shape index: {}, may-alias: {3,7}]   ;;  %s859_s4 = inlined_call_operand.vmem [shape: f32[8,128], index: 4, kind: input, shape index: {}, may-alias: {4,8}]   ;;  %s860_s5 = inlined_call_operand.hbm [shape: bf16[128,128], index: 5, kind: input, shape index: {}]   ;;  %s861_s6 = inlined_call_operand.vmem [shape: f32[1,128], index: 6, kind: input, shape index: {}]   ;;  %s862_s7 = inlined_call_operand.vmem [shape: f32[8,128], index: 7, kind: input, shape index: {}, may-alias: {3,7}]   ;;  %s863_s8 = inlined_call_operand.vmem [shape: f32[8,128], index: 8, kind: input, shape index: {}, may-alias: {4,8}]   ;;  %s864_s9 = inlined_call_operand.hbm [shape: bf16[128,16], index: 9, kind: input, shape index: {}]   ;;  %s865_s10 = inlined_call_operand.vmem [shape: f32[1,16], index: 10, kind: input, shape index: {}]   ;;  %s866_s11 = inlined_call_operand.hbm [shape: f32[2,8,16], index: 11, kind: output, shape index: {}]  }
   0x1   :  { %17 = vsyncpa [#allocation6], 0 }
   0x2   :  { %18 = vsyncpa [#allocation4], 0  ;;  %s696_s17 = smov [#allocation2]   ;;  %s624_s21 = scalar_lea.hbm %s860_s5, 1024 }
   0x3   :  { %s34_s18 = sshll.u32 %s696_s17, 4  ;;  %p625_p0 = scmp.ne.s32.totalorder %s860_s5, %s624_s21  ;;  %s35_s18 = int_to_ptr.vmem [resolvable:$true] %s34_s18 }
   0x4   :  { %p628_p1 = scmp.lt.u32.totalorder %s624_s21, %s860_s5 }
   0x6   :  { %p630_p2 = pnand %p628_p1, %p625_p0 }
   0x8   :  { %633 = shalt.err (!%p630_p2)
}
   0x9   :  { %s634_s26 = scalar_lea.vmem %s35_s18, 1024  ;;  %p639_p4 = scmp.lt.s32.totalorder %s35_s18, %s35_s18 }
   0xa   :  { %p635_p3 = scmp.ne.s32.totalorder %s35_s18, %s634_s26  ;;  %p640_p5 = scmp.lt.s32.totalorder %s634_s26, %s634_s26 }
   0xc   :  { %p641_p6 = por %p640_p5, %p639_p4 }
   0xe   :  { %p642_p7 = pnand %p641_p6, %p635_p3 }
  0x10   :  { %645 = shalt.err (!%p642_p7)
}
  0x11   :  { %s697_s27 = smov 64   ;;  %s698_s28 = smov 4  }
  0x12   :  { %40 = dma.hbm_to_vmem [thread:$0]  %s860_s5, 1024, %s35_s18, [#allocation3], %s697_s27, %s697_s27, %s698_s28  }
  0x13   :  { %s699_s12 = smov [#allocation5]   ;;  %s646_s16 = scalar_lea.hbm %s864_s9, 1024 }
  0x14   :  { %s52_s13 = sshll.u32 %s699_s12, 4  ;;  %p647_p8 = scmp.ne.s32.totalorder %s864_s9, %s646_s16  ;;  %s53_s13 = int_to_ptr.vmem [resolvable:$true] %s52_s13 }
  0x15   :  { %p650_p9 = scmp.lt.u32.totalorder %s646_s16, %s864_s9 }
  0x17   :  { %p652_p10 = pnand %p650_p9, %p647_p8 }
  0x19   :  { %655 = shalt.err (!%p652_p10)
}
  0x1a   :  { %s656_s22 = scalar_lea.vmem %s53_s13, 1024  ;;  %p661_p12 = scmp.lt.s32.totalorder %s53_s13, %s53_s13 }
  0x1b   :  { %p657_p11 = scmp.ne.s32.totalorder %s53_s13, %s656_s22  ;;  %p662_p13 = scmp.lt.s32.totalorder %s656_s22, %s656_s22 }
  0x1d   :  { %p663_p0 = por %p662_p13, %p661_p12 }
  0x1f   :  { %p664_p1 = pnand %p663_p0, %p657_p11 }
  0x21   :  { %667 = shalt.err (!%p664_p1)
}
  0x22   :  { %58 = dma.hbm_to_vmem [thread:$0]  %s864_s9, 1024, %s53_s13, [#allocation6], %s697_s27, %s697_s27, %s698_s28  }
  0x23   :  { %690 = dma.done.wait [#allocation3], 1024  }
  0x24   :  { %691 = vsyncadd [#allocation3], 4294966272 }
  0x25   :  { %692 = dma.done.wait [#allocation6], 1024  }
  0x26   :  { %693 = vsyncadd [#allocation6], 4294966272  ;;  %v700_v0 = vmov 0.0   ;;  %vm701_vm0 = vmmov 0   ;;  %v598_v1 = vld [vmem:[%s856_s1] sm:$0xff]   ;;  %v599_v2 = vld [vmem:[%s856_s1 + $0x8] sm:$0xff]  }
  0x27   :  { %541 = vmatprep.subr.bf16.mxu0 %v700_v0  ;;  %545 = vmatprep.mubr.msk.bf16.mxu0 %vm701_vm0, %v700_v0  ;;  %v68_v3 = vld [vmem:[%s855_s0] sm:$0xff]  ;;  %v69_v4 = vld [vmem:[%s855_s0 + $0x8] sm:$0xff]  ;;  %vm96_vm1 = vcmask 261120   ;;  %v602_v35 = vld [vmem:[#allocation2 + $0x10] sm:$0xff]   ;;  %vm477_vm2 = vcmask 130048  }
  0x28   :  { %549 = vmatprep.subr.bf16.mxu1 %v700_v0  ;;  %565 = vmatprep.mubr.msk.bf16.mxu1 %vm701_vm0, %v700_v0  ;;  %v77_v5 = vpack.c.bf16 %v69_v4, %v68_v3  ;;  %v498_v6 = vld [vmem:[%s857_s2] ss:$0 sm:$0xff]  ;;  %v601_v34 = vld [vmem:[#allocation2 + $0x8] sm:$0xff]   ;;  %v603_v36 = vld [vmem:[#allocation2 + $0x18] sm:$0xff]  }
  0x29   :  { %542 = vmatpush3.bf16.msra.mxu0 %v598_v1  ;;  %v600_v33 = vld [vmem:[#allocation2] sm:$0xff]   ;;  %v605_v38 = vld [vmem:[#allocation2 + $0x28] sm:$0xff]   ;;  %v606_v39 = vld [vmem:[#allocation2 + $0x30] sm:$0xff]  }
  0x2a   :  { %543 = vmatprep.subr.bf16.mxu0 %v700_v0  ;;  %550 = vmatpush3.bf16.msra.mxu1 %v600_v33  ;;  %v604_v37 = vld [vmem:[#allocation2 + $0x20] sm:$0xff]   ;;  %v607_v40 = vld [vmem:[#allocation2 + $0x38] sm:$0xff]  }
  0x2b   :  { %551 = vmatprep.subr.bf16.mxu1 %v700_v0  ;;  %v75_v60 = vld [vmem:[%s858_s3] sm:$0xff] }
  0x2c   :  { %v76_v62 = vld [vmem:[%s859_s4] sm:$0xff] }
  0x2d   :  { %544 = vmatpush3.bf16.msra.mxu0 %v599_v2 }
  0x2e   :  { %569 = vmatprep.subr.bf16.mxu0 %v700_v0  ;;  %552 = vmatpush3.bf16.msra.mxu1 %v601_v34 }
  0x2f   :  { %553 = vmatprep.subr.bf16.mxu1 %v700_v0 }
  0x30   :  { %546 = vmatmul.mubr.msk.bf16.vlgmr.msra.gmra.mrb[0].mxu0 %vm96_vm1, %v77_v5 }
  0x31   :  { %585 = vmatprep.mubr.msk.bf16.mxu0 %vm701_vm0, %v700_v0 }
  0x32   :  { %554 = vmatpush3.bf16.msra.mxu1 %v602_v35 }
  0x33   :  { %555 = vmatprep.subr.bf16.mxu1 %v700_v0 }
  0x36   :  { %556 = vmatpush3.bf16.msra.mxu1 %v603_v36 }
  0x37   :  { %557 = vmatprep.subr.bf16.mxu1 %v700_v0 }
  0x3a   :  { %558 = vmatpush3.bf16.msra.mxu1 %v604_v37 }
  0x3b   :  { %559 = vmatprep.subr.bf16.mxu1 %v700_v0 }
  0x3e   :  { %560 = vmatpush3.bf16.msra.mxu1 %v605_v38  ;;  %v608_v38 = vld [vmem:[#allocation5] sm:$0xff]  }
  0x3f   :  { %561 = vmatprep.subr.bf16.mxu1 %v700_v0  ;;  %570 = vmatpush3.bf16.msra.mxu0 %v608_v38 }
  0x40   :  { %571 = vmatprep.subr.bf16.mxu0 %v700_v0 }
  0x42   :  { %562 = vmatpush3.bf16.msra.mxu1 %v606_v39  ;;  %v609_v39 = vld [vmem:[#allocation5 + $0x8] sm:$0xff]  }
  0x43   :  { %563 = vmatprep.subr.bf16.mxu1 %v700_v0  ;;  %572 = vmatpush3.bf16.msra.mxu0 %v609_v39 }
  0x44   :  { %573 = vmatprep.subr.bf16.mxu0 %v700_v0 }
  0x46   :  { %564 = vmatpush3.bf16.msra.mxu1 %v607_v40  ;;  %v610_v40 = vld [vmem:[#allocation5 + $0x10] sm:$0xff]  }
  0x47   :  { %574 = vmatpush3.bf16.msra.mxu0 %v610_v40 }
  0x48   :  { %575 = vmatprep.subr.bf16.mxu0 %v700_v0 }
 0x103   :  { %v134_v7 = vpop.f32.mrb[0].mxu0 }
 0x104   :  { %v135_v8 = vadd.f32 %v498_v6, %v134_v7  ;;  %v547_v9 = vpop.f32.mrb[1].mxu0 }
 0x105   :  { %v137_v10 = vpop.f32.mrb[2].mxu0 }
 0x106   :  { %141 = vadd.xlane.f32.xlu0 %v135_v8  ;;  %v548_v11 = vpop.f32.mrb[3].mxu0  ;;  %v138_v12 = vadd.f32 %v498_v6, %v137_v10 }
 0x107   :  { %v502_v11 = vld [vmem:[%s861_s6] ss:$0 sm:$0xff] }
 0x10a   :  { %143 = vadd.xlane.f32.xlu0 %v138_v12 }
 0x193   :  { %v142_v13 = vpop.xlane.xlu0 %141 }
 0x194   :  { %v145_v14 = vrot.slane %v142_v13, 4 }
 0x196   :  { %v146_v15 = vadd.f32 %v145_v14, %v142_v13 }
 0x197   :  { %v144_v16 = vpop.xlane.xlu0 %143 }
 0x198   :  { %v147_v17 = vrot.slane %v146_v15, 2  ;;  %v151_v18 = vrot.slane %v144_v16, 4 }
 0x19a   :  { %v148_v19 = vadd.f32 %v147_v17, %v146_v15  ;;  %v152_v20 = vadd.f32 %v151_v18, %v144_v16 }
 0x19c   :  { %v149_v21 = vrot.slane %v148_v19, 1  ;;  %v153_v22 = vrot.slane %v152_v20, 2 }
 0x19e   :  { %v154_v23 = vadd.f32 %v153_v22, %v152_v20  ;;  %v150_v24 = vadd.f32 %v149_v21, %v148_v19 }
 0x1a0   :  { %v155_v25 = vrot.slane %v154_v23, 1  ;;  %v157_v26 = vmul.f32 0.0009765625, %v150_v24 }
 0x1a2   :  { %v156_v27 = vadd.f32 %v155_v25, %v154_v23  ;;  %v159_v28 = vsub.f32 %v135_v8, %v157_v26 }
 0x1a4   :  { %v161_v29 = vmul.f32 %v159_v28, %v159_v28  ;;  %v158_v30 = vmul.f32 0.0009765625, %v156_v27 }
 0x1a6   :  { %163 = vadd.xlane.f32.xlu1 %v161_v29  ;;  %v160_v31 = vsub.f32 %v138_v12, %v158_v30 }
 0x1a8   :  { %v162_v32 = vmul.f32 %v160_v31, %v160_v31 }
 0x1aa   :  { %165 = vadd.xlane.f32.xlu1 %v162_v32 }
 0x233   :  { %v164_v41 = vpop.xlane.xlu1 %163 }
 0x234   :  { %v167_v42 = vrot.slane %v164_v41, 4 }
 0x236   :  { %v168_v43 = vadd.f32 %v167_v42, %v164_v41  ;;  %v611_v41 = vld [vmem:[#allocation5 + $0x18] sm:$0xff]   ;;  %v612_v42 = vld [vmem:[#allocation5 + $0x20] sm:$0xff]  }
 0x237   :  { %v166_v44 = vpop.xlane.xlu1 %165  ;;  %576 = vmatpush3.bf16.msra.mxu0 %v611_v41 }
 0x238   :  { %v169_v45 = vrot.slane %v168_v43, 2  ;;  %v173_v46 = vrot.slane %v166_v44, 4  ;;  %577 = vmatprep.subr.bf16.mxu0 %v700_v0 }
 0x23a   :  { %v170_v47 = vadd.f32 %v169_v45, %v168_v43  ;;  %v174_v48 = vadd.f32 %v173_v46, %v166_v44  ;;  %v613_v43 = vld [vmem:[#allocation5 + $0x28] sm:$0xff]   ;;  %v614_v44 = vld [vmem:[#allocation5 + $0x30] sm:$0xff]   ;;  %v615_v45 = vld [vmem:[#allocation5 + $0x38] sm:$0xff]  }
 0x23b   :  { %578 = vmatpush3.bf16.msra.mxu0 %v612_v42 }
 0x23c   :  { %v171_v49 = vrot.slane %v170_v47, 1  ;;  %v175_v50 = vrot.slane %v174_v48, 2  ;;  %579 = vmatprep.subr.bf16.mxu0 %v700_v0 }
 0x23e   :  { %v172_v51 = vadd.f32 %v171_v49, %v170_v47  ;;  %v176_v52 = vadd.f32 %v175_v50, %v174_v48 }
 0x23f   :  { %580 = vmatpush3.bf16.msra.mxu0 %v613_v43 }
 0x240   :  { %v179_v53 = vmul.f32 0.0009765625, %v172_v51  ;;  %v177_v54 = vrot.slane %v176_v52, 1  ;;  %581 = vmatprep.subr.bf16.mxu0 %v700_v0 }
 0x242   :  { %v181_v55 = vadd.f32 1e-05, %v179_v53  ;;  %v178_v56 = vadd.f32 %v177_v54, %v176_v52 }
 0x243   :  { %582 = vmatpush3.bf16.msra.mxu0 %v614_v44 }
 0x244   :  { %616 = vrsqrt.f32 %v181_v55  ;;  %v180_v57 = vmul.f32 0.0009765625, %v178_v56  ;;  %583 = vmatprep.subr.bf16.mxu0 %v700_v0 }
 0x246   :  { %v182_v58 = vadd.f32 1e-05, %v180_v57 }
 0x247   :  { %584 = vmatpush3.bf16.msra.mxu0 %v615_v45 }
 0x248   :  { %618 = vrsqrt.f32 %v182_v58 }
 0x24e   :  { %v617_v59 = vpop.eup %616 }
 0x24f   :  { %v185_v61 = vmul.f32 %v617_v59, %v159_v28 }
 0x251   :  { %v187_v63 = vmul.f32 %v185_v61, %v75_v60 }
 0x252   :  { %v619_v1 = vpop.eup %618 }
 0x253   :  { %v186_v2 = vmul.f32 %v619_v1, %v160_v31  ;;  %v189_v3 = vadd.f32 %v187_v63, %v76_v62  ;;  %v212_v1 = vld [vmem:[%s862_s7] sm:$0xff]  ;;  %s702_s7 = smov [#allocation7]  }
 0x254   :  { %s485_s20 = sshll.u32 %s702_s7, 4  ;;  %s486_s20 = int_to_ptr.vmem [resolvable:$true] %s485_s20 }
 0x255   :  { %v188_v4 = vmul.f32 %v186_v2, %v75_v60  ;;  %v191_v6 = vmul.f32 0.01, %v189_v3  ;;  %p673_p3 = scmp.lt.s32.totalorder %s486_s20, %s486_s20 }
 0x257   :  { %v190_v5 = vadd.f32 %v188_v4, %v76_v62  ;;  %v193_v8 = vmax.f32 %v189_v3, %v191_v6  ;;  %v213_v4 = vld [vmem:[%s863_s8] sm:$0xff]  ;;  %s668_s8 = scalar_lea.vmem %s486_s20, 256 }
 0x258   :  { %p669_p2 = scmp.ne.s32.totalorder %s486_s20, %s668_s8  ;;  %p674_p4 = scmp.lt.s32.totalorder %s668_s8, %s668_s8 }
 0x259   :  { %v192_v7 = vmul.f32 0.01, %v190_v5 }
 0x25a   :  { %p675_p5 = por %p674_p4, %p673_p3 }
 0x25b   :  { %v194_v9 = vmax.f32 %v190_v5, %v192_v7 }
 0x25c   :  { %p676_p6 = pnand %p675_p5, %p669_p2 }
 0x25d   :  { %v214_v10 = vpack.c.bf16 %v194_v9, %v193_v8 }
 0x25f   :  { %566 = vmatmul.mubr.bf16.vlgmr.msra.gmra.mrb[0].mxu1 %v214_v10 }
 0x332   :  { %v303_v12 = vpop.f32.mrb[0].mxu1 }
 0x333   :  { %v304_v13 = vadd.f32 %v502_v11, %v303_v12  ;;  %v567_v14 = vpop.f32.mrb[1].mxu1 }
 0x334   :  { %v306_v15 = vpop.f32.mrb[2].mxu1 }
 0x335   :  { %v307_v16 = vadd.f32 %v502_v11, %v306_v15  ;;  %310 = vadd.xlane.f32.xlu0 %v304_v13  ;;  %v568_v17 = vpop.f32.mrb[3].mxu1  ;;  %v511_v15 = vld [vmem:[%s865_s10] ss:$0 sm:$0xff] }
 0x337   :  { %312 = vadd.xlane.f32.xlu1 %v307_v16 }
 0x3c2   :  { %v311_v18 = vpop.xlane.xlu0 %310 }
 0x3c3   :  { %v314_v19 = vrot.slane %v311_v18, 4 }
 0x3c4   :  { %v313_v20 = vpop.xlane.xlu1 %312 }
 0x3c5   :  { %v315_v21 = vadd.f32 %v314_v19, %v311_v18  ;;  %v320_v22 = vrot.slane %v313_v20, 4 }
 0x3c7   :  { %v316_v23 = vrot.slane %v315_v21, 2  ;;  %v321_v24 = vadd.f32 %v320_v22, %v313_v20 }
 0x3c9   :  { %v317_v25 = vadd.f32 %v316_v23, %v315_v21  ;;  %v322_v26 = vrot.slane %v321_v24, 2 }
 0x3cb   :  { %v318_v27 = vrot.slane %v317_v25, 1  ;;  %v323_v28 = vadd.f32 %v322_v26, %v321_v24 }
 0x3cd   :  { %v319_v29 = vadd.f32 %v318_v27, %v317_v25  ;;  %v324_v30 = vrot.slane %v323_v28, 1 }
 0x3cf   :  { %v325_v31 = vadd.f32 %v324_v30, %v323_v28  ;;  %v326_v32 = vmul.f32 0.0009765625, %v319_v29 }
 0x3d1   :  { %v328_v33 = vsub.f32 %v304_v13, %v326_v32  ;;  %v327_v34 = vmul.f32 0.0009765625, %v325_v31 }
 0x3d3   :  { %v330_v35 = vmul.f32 %v328_v33, %v328_v33  ;;  %v329_v36 = vsub.f32 %v307_v16, %v327_v34 }
 0x3d5   :  { %332 = vadd.xlane.f32.xlu0 %v330_v35  ;;  %v331_v37 = vmul.f32 %v329_v36, %v329_v36 }
 0x3d7   :  { %334 = vadd.xlane.f32.xlu1 %v331_v37 }
 0x462   :  { %v333_v46 = vpop.xlane.xlu0 %332 }
 0x463   :  { %v336_v47 = vrot.slane %v333_v46, 4 }
 0x464   :  { %v335_v48 = vpop.xlane.xlu1 %334 }
 0x465   :  { %v337_v49 = vadd.f32 %v336_v47, %v333_v46  ;;  %v342_v50 = vrot.slane %v335_v48, 4 }
 0x467   :  { %v338_v51 = vrot.slane %v337_v49, 2  ;;  %v343_v52 = vadd.f32 %v342_v50, %v335_v48 }
 0x469   :  { %v339_v53 = vadd.f32 %v338_v51, %v337_v49  ;;  %v344_v54 = vrot.slane %v343_v52, 2 }
 0x46b   :  { %v340_v55 = vrot.slane %v339_v53, 1  ;;  %v345_v56 = vadd.f32 %v344_v54, %v343_v52 }
 0x46d   :  { %v341_v57 = vadd.f32 %v340_v55, %v339_v53  ;;  %v346_v58 = vrot.slane %v345_v56, 1 }
 0x46f   :  { %v348_v59 = vmul.f32 0.0009765625, %v341_v57  ;;  %v347_v60 = vadd.f32 %v346_v58, %v345_v56 }
 0x471   :  { %v350_v61 = vadd.f32 1e-05, %v348_v59  ;;  %v349_v62 = vmul.f32 0.0009765625, %v347_v60 }
 0x473   :  { %620 = vrsqrt.f32 %v350_v61  ;;  %v351_v0 = vadd.f32 1e-05, %v349_v62 }
 0x475   :  { %622 = vrsqrt.f32 %v351_v0 }
 0x47d   :  { %v621_v63 = vpop.eup %620 }
 0x47e   :  { %v354_v2 = vmul.f32 %v621_v63, %v328_v33 }
 0x47f   :  { %v623_v3 = vpop.eup %622 }
 0x480   :  { %v355_v5 = vmul.f32 %v623_v3, %v329_v36  ;;  %v356_v6 = vmul.f32 %v354_v2, %v212_v1 }
 0x482   :  { %v357_v7 = vmul.f32 %v355_v5, %v212_v1  ;;  %v358_v8 = vadd.f32 %v356_v6, %v213_v4 }
 0x484   :  { %v359_v9 = vadd.f32 %v357_v7, %v213_v4  ;;  %v360_v10 = vmul.f32 0.01, %v358_v8 }
 0x486   :  { %v361_v11 = vmul.f32 0.01, %v359_v9  ;;  %v362_v12 = vmax.f32 %v358_v8, %v360_v10 }
 0x488   :  { %v363_v13 = vmax.f32 %v359_v9, %v361_v11 }
 0x48a   :  { %v381_v14 = vpack.c.bf16 %v363_v13, %v362_v12 }
 0x48c   :  { %586 = vmatmul.mubr.bf16.vlgmr.msra.gmra.mrb[4].mxu0 %v381_v14 }
 0x55f   :  { %v470_v16 = vpop.f32.mrb[4].mxu0 }
 0x560   :  { %v471_v17 = vadd.f32 %v511_v15, %v470_v16  ;;  %v587_v18 = vpop.f32.mrb[5].mxu0 }
 0x561   :  { %v473_v19 = vpop.f32.mrb[6].mxu0 }
 0x562   :  { %478 = vst.msk [vmem:[#allocation7] sm:$0xff] %vm477_vm2, %v471_v17  ;;  %v474_v20 = vadd.f32 %v511_v15, %v473_v19  ;;  %v588_v21 = vpop.f32.mrb[7].mxu0 }
 0x564   :  { %479 = vst.msk [vmem:[#allocation7 + $0x8] sm:$0xff] %vm477_vm2, %v474_v20 }
 0x565   :  { %679 = shalt.err (!%p676_p6)
}
 0x566   :  { %s680_s22 = scalar_lea.hbm %s866_s11, 256 }
 0x567   :  { %p681_p7 = scmp.ne.s32.totalorder %s866_s11, %s680_s22  ;;  %p684_p8 = scmp.lt.u32.totalorder %s680_s22, %s866_s11 }
 0x569   :  { %p686_p9 = pnand %p684_p8, %p681_p7 }
 0x56b   :  { %689 = shalt.err (!%p686_p9)
}
 0x56c   :  { %s703_s9 = smov 128   ;;  %s704_s25 = smov 8  }
 0x56d   :  { %491 = dma.vmem_to_hbm [thread:$0]  %s486_s20, 256, %s866_s11, [#allocation4], %s703_s9, %s703_s9, %s704_s25  }
 0x56e   :  { %694 = dma.done.wait [#allocation4], 256  }
 0x56f   :  { %695 = vsyncadd [#allocation4], 4294967040 }
 0x570   :  { %495 = vsyncpa [#allocation3], 1 }
 0x571   :  { %496 = vsyncpa [#allocation6], 1 }
 0x572   :  { %497 = vsyncpa [#allocation4], 1 }

</bundles_post_ra>
